<compile_context>
chip_gen: v5e
topology: v5e:2x2
jax: 0.10.0
libtpu: 0.0.40
codegen_flags: <defaults>
</compile_context>

<pallas_src>
import functools
import math

import jax
import jax.numpy as jnp
from jax.experimental import pallas as pl
from jax.experimental.pallas import tpu as pltpu

_SQRT2 = math.sqrt(2.0)
_QUARTER_PI = math.pi / 4.0


def _pos_enc_kernel(pos_ref, x_ref, div_ref, base_ref, o_ref, *, fold):
    # pos_ref  : SMEM (1,) int32 scalar-prefetch ref -> sequence offset `pos`.
    # x_ref    : (ts, tc) VMEM tile of the folded input.
    # div_ref  : (1, tc) div_term[c % D] per flattened column.
    # base_ref : (1, tc) (c // (B*D)) * div_term[c % D] per flattened column.
    # o_ref    : (ts, tc) output tile.
    # fold     : number of original sequence rows folded into the lane axis.
    i = pl.program_id(0)
    ts = x_ref.shape[0]

    # Sequence-position contribution of each (folded) row: pos + r*fold.
    r0 = pos_ref[0] + i * ts * fold
    rows = jax.lax.broadcasted_iota(jnp.int32, (ts, 1), 0) * fold + r0
    rows = rows.astype(jnp.float32)

    # angle[r, c] = (pos + r*fold + c//(B*D)) * div_term[c % D]
    angle = rows * div_ref[...] + base_ref[...]

    # sin(a) + cos(a) == sqrt(2) * sin(a + pi/4): one transcendental per elem.
    pe = _SQRT2 * jnp.sin(angle + _QUARTER_PI)

    o_ref[...] = x_ref[...] + pe.astype(o_ref.dtype)


def _fold_factor(S, BD):
    """Smallest k with (k*BD) % 128 == 0 and S % k == 0 (else 1 = no fold)."""
    k = 128 // math.gcd(BD, 128)
    if k > 1 and (S % k != 0):
        return 1
    return k


def _select_tiles(R, C, itemsize, target_block_bytes):
    """Pick a (ts, tc) block of ~target_block_bytes with aligned dims."""
    row_align = max(8, 32 // max(1, itemsize))   # 8 f32 / 16 bf16 / 32 int8
    row_bytes = C * itemsize

    if row_bytes >= target_block_bytes:
        # Very wide rows: keep one aligned row-group and tile the lane axis.
        ts = min(R, row_align)
        tc = (target_block_bytes // max(1, ts * itemsize)) // 128 * 128
        tc = min(max(tc, 128), C)
    else:
        tc = C
        ts = target_block_bytes // max(1, row_bytes)
        if ts >= R and R >= 2 * row_align:
            # Give the row grid >= 2 steps so v7x's 2 TCs both get work.
            ts = row_align * pl.cdiv(pl.cdiv(R, 2), row_align)
        ts = min(ts, R)
        if ts < R:
            ts = (ts // row_align) * row_align
            if ts == 0:
                ts = R
    return int(ts), int(tc)


def positional_encoding(x, pos=0, *, target_block_bytes=2 << 20):
    """x: (S, B, D) float array. Returns x + pe[pos:pos+S] (dropout = identity)."""
    S, B, D = x.shape
    BD = B * D
    itemsize = jnp.dtype(x.dtype).itemsize

    # Fold k sequence rows into the lane axis -> last dim multiple of 128.
    k = _fold_factor(S, BD)
    R, C = S // k, k * BD
    x2 = x.reshape(R, C)                              # free row-major reshape

    ts, tc = _select_tiles(R, C, itemsize, target_block_bytes)
    grid = (pl.cdiv(R, ts), pl.cdiv(C, tc))

    pos_arr = jnp.asarray([pos], dtype=jnp.int32)

    # div_col[c]  = exp((c % D) * -ln(10000)/D)
    # base_col[c] = (c // (B*D)) * div_col[c]   (row-local t offset of column c)
    d_idx = jnp.arange(D, dtype=jnp.float32)
    div_term = jnp.exp(d_idx * (-math.log(10000.0) / D))          # (D,)
    div_col = jnp.tile(div_term, k * B).reshape(1, C)             # (1, C)
    t_off = jnp.repeat(jnp.arange(k, dtype=jnp.float32), BD).reshape(1, C)
    base_col = t_off * div_col                                    # (1, C)

    n_elems = S * BD
    cost = pl.CostEstimate(
        flops=4 * n_elems,                    # mul + 2 adds + add-to-x
        transcendentals=n_elems,              # one sin per element
        bytes_accessed=2 * n_elems * itemsize + 2 * C * 4,
    )

    # Scoped-VMEM limit: double-buffered in+out blocks + aux rows + slack.
    # Stays well under v5e/v6e defaults and v7x's 64 MiB physical VMEM.
    block_bytes = ts * tc * itemsize
    vmem_needed = 4 * block_bytes + 4 * (tc * 4) * 2 + (2 << 20)
    vmem_limit = int(min(max(vmem_needed, 8 << 20), 48 << 20))

    kernel = functools.partial(_pos_enc_kernel, fold=k)

    out2 = pl.pallas_call(
        kernel,
        out_shape=jax.ShapeDtypeStruct((R, C), x.dtype),
        grid_spec=pltpu.PrefetchScalarGridSpec(
            num_scalar_prefetch=1,
            grid=grid,
            in_specs=[
                pl.BlockSpec((ts, tc), lambda i, j, pos_ref: (i, j)),
                pl.BlockSpec((1, tc), lambda i, j, pos_ref: (0, j)),
                pl.BlockSpec((1, tc), lambda i, j, pos_ref: (0, j)),
            ],
            out_specs=pl.BlockSpec((ts, tc), lambda i, j, pos_ref: (i, j)),
        ),
        compiler_params=pltpu.CompilerParams(
            dimension_semantics=("parallel", "parallel"),
            vmem_limit_bytes=vmem_limit,
        ),
        cost_estimate=cost,
    )(pos_arr, x2, div_col, base_col)

    return out2.reshape(S, B, D)


def _reference(x, pos=0):
    S, B, D = x.shape
    max_len = pos + S
    position = jnp.arange(0, max_len, dtype=jnp.float32)[:, None]        # (max_len, 1)
    div_term = jnp.exp(jnp.arange(0, D, dtype=jnp.float32) *
                       (-math.log(10000.0) / D))                         # (D,)
    pe = jnp.sin(position * div_term) + jnp.cos(position * div_term)     # (max_len, D)
    pe = pe[:, None, :]                                                  # (max_len, 1, D)
    return x + pe[pos:pos + S]


if __name__ == "__main__":
    key = jax.random.PRNGKey(0)

    # Main demo shape (TranAD-like): seq=8, batch=2, d_model=32 -> folds 2 rows
    # into the lane axis (C = 128, unmasked lane-dense stores).
    S, B, D = 8, 2, 32
    pos = 3
    x = jax.random.normal(key, (S, B, D), dtype=jnp.float32)

    out = positional_encoding(x, pos=pos)
    out = jax.block_until_ready(out)
    ref = _reference(x, pos=pos)
    assert out.shape == (S, B, D)
    assert jnp.allclose(out, ref, atol=1e-5, rtol=1e-5), "mismatch vs reference"

    # Fallback path (B*D not foldable to a multiple of 128): still correct.
    S2, B2, D2 = 8, 3, 20
    x2 = jax.random.normal(jax.random.PRNGKey(1), (S2, B2, D2), dtype=jnp.float32)
    out2 = jax.block_until_ready(positional_encoding(x2, pos=1))
    ref2 = _reference(x2, pos=1)
    assert jnp.allclose(out2, ref2, atol=1e-5, rtol=1e-5), "mismatch (fallback)"

    print("KERNEL_OK")
</pallas_src>

<mosaic_0001>
module attributes {stable_mosaic.version = 11 : i64} {
  func.func @_pos_enc_kernel(%arg0: i32, %arg1: i32, %arg2: memref<1xi32, #tpu.memory_space<smem>>, %arg3: memref<4x128xf32, #tpu.memory_space<vmem>>, %arg4: memref<1x128xf32, #tpu.memory_space<vmem>>, %arg5: memref<1x128xf32, #tpu.memory_space<vmem>>, %arg6: memref<4x128xf32, #tpu.memory_space<vmem>>) attributes {dimension_semantics = [#tpu.dimension_semantics<parallel>, #tpu.dimension_semantics<parallel>], iteration_bounds = array<i64: 1, 1>, scalar_prefetch = 1 : i64, scratch_operands = 0 : i64, tpu.core_type = #tpu.core_type<tc>, window_params = [{transform_indices = @transform_0, window_bounds = array<i64: 4, 128>}, {transform_indices = @transform_1, window_bounds = array<i64: 1, 128>}, {transform_indices = @transform_2, window_bounds = array<i64: 1, 128>}, {transform_indices = @transform_3, window_bounds = array<i64: 4, 128>}]} {
    %c0 = arith.constant 0 : index
    %0 = memref.load %arg2[%c0] : memref<1xi32, #tpu.memory_space<smem>>
    %c4_i32 = arith.constant 4 : i32
    %1 = arith.muli %arg0, %c4_i32 : i32
    %c2_i32 = arith.constant 2 : i32
    %2 = arith.muli %1, %c2_i32 : i32
    %3 = arith.addi %0, %2 : i32
    %4 = tpu.iota {dimensions = array<i32: 0>} : vector<4x1xi32>
    %c2_i32_0 = arith.constant 2 : i32
    %5 = vector.broadcast %c2_i32_0 : i32 to vector<4x1xi32>
    %6 = arith.muli %4, %5 : vector<4x1xi32>
    %7 = vector.broadcast %3 : i32 to vector<4x1xi32>
    %8 = arith.addi %6, %7 : vector<4x1xi32>
    %9 = arith.sitofp %8 : vector<4x1xi32> to vector<4x1xf32>
    %c0_1 = arith.constant 0 : index
    %c0_2 = arith.constant 0 : index
    %10 = vector.load %arg4[%c0_1, %c0_2] : memref<1x128xf32, #tpu.memory_space<vmem>>, vector<1x128xf32>
    %11 = vector.broadcast %9 : vector<4x1xf32> to vector<4x128xf32>
    %12 = vector.broadcast %10 : vector<1x128xf32> to vector<4x128xf32>
    %13 = arith.mulf %11, %12 : vector<4x128xf32>
    %c0_3 = arith.constant 0 : index
    %c0_4 = arith.constant 0 : index
    %14 = vector.load %arg5[%c0_3, %c0_4] : memref<1x128xf32, #tpu.memory_space<vmem>>, vector<1x128xf32>
    %15 = vector.broadcast %14 : vector<1x128xf32> to vector<4x128xf32>
    %16 = arith.addf %13, %15 : vector<4x128xf32>
    %cst = arith.constant 0.785398185 : f32
    %17 = vector.broadcast %cst : f32 to vector<4x128xf32>
    %18 = arith.addf %16, %17 : vector<4x128xf32>
    %19 = math.sin %18 : vector<4x128xf32>
    %cst_5 = arith.constant 1.41421354 : f32
    %20 = vector.broadcast %cst_5 : f32 to vector<4x128xf32>
    %21 = arith.mulf %20, %19 : vector<4x128xf32>
    %c0_6 = arith.constant 0 : index
    %c0_7 = arith.constant 0 : index
    %22 = vector.load %arg3[%c0_6, %c0_7] : memref<4x128xf32, #tpu.memory_space<vmem>>, vector<4x128xf32>
    %23 = arith.addf %22, %21 : vector<4x128xf32>
    %c0_8 = arith.constant 0 : index
    %c0_9 = arith.constant 0 : index
    %24 = vector.load %arg6[%c0_8, %c0_9] : memref<4x128xf32, #tpu.memory_space<vmem>>, vector<4x128xf32>
    tpu.vector_store %arg6[%c0_8, %c0_9], %23 {strides = array<i32>} : memref<4x128xf32, #tpu.memory_space<vmem>>, vector<4x128xf32>,
    return
  }
  func.func @transform_0(%arg0: i32, %arg1: i32, %arg2: memref<1xi32, #tpu.memory_space<smem>>) -> (i32, i32) {
    %c0_i32 = arith.constant 0 : i32
    return %arg0, %arg1 : i32, i32
  }
  func.func @transform_1(%arg0: i32, %arg1: i32, %arg2: memref<1xi32, #tpu.memory_space<smem>>) -> (i32, i32) {
    %c0_i32 = arith.constant 0 : i32
    %c0_i32_0 = arith.constant 0 : i32
    return %c0_i32, %arg1 : i32, i32
  }
  func.func @transform_2(%arg0: i32, %arg1: i32, %arg2: memref<1xi32, #tpu.memory_space<smem>>) -> (i32, i32) {
    %c0_i32 = arith.constant 0 : i32
    %c0_i32_0 = arith.constant 0 : i32
    return %c0_i32, %arg1 : i32, i32
  }
  func.func @transform_3(%arg0: i32, %arg1: i32, %arg2: memref<1xi32, #tpu.memory_space<smem>>) -> (i32, i32) {
    %c0_i32 = arith.constant 0 : i32
    return %arg0, %arg1 : i32, i32
  }
}

</mosaic_0001>

<bundles_post_ra>
// kernel: tpu_custom_call.1
= control target key start
LH: loop header
LB: loop body
LE: loop exit
PB: predicated region body
PF: predicated region fallthrough
CT: control target
= control target key end

     0   :  { %10 = vsyncpa [#allocation5], 0  ;;  %s388_s0 = inlined_call_operand.<no memory space> [shape: s32[1], index: 0, kind: input, shape index: {}]   ;;  %s389_s1 = inlined_call_operand.hbm [shape: f32[4,128], index: 1, kind: input, shape index: {}]   ;;  %s390_s2 = inlined_call_operand.vmem [shape: f32[1,128], index: 2, kind: input, shape index: {}]   ;;  %s391_s3 = inlined_call_operand.vmem [shape: f32[1,128], index: 3, kind: input, shape index: {}]   ;;  %s392_s4 = inlined_call_operand.hbm [shape: f32[4,128], index: 4, kind: output, shape index: {}]  }
   0x1   :  { %11 = vsyncpa [#allocation6], 0  ;;  %s17_s17 = sshll.u32 %s389_s1, 4  ;;  %s293_s18 = smov [#allocation4]   ;;  %s18_s17 = int_to_ptr.hbm [resolvable:$true] %s17_s17 }
   0x2   :  { %s19_s19 = sshll.u32 %s293_s18, 4  ;;  %s20_s19 = int_to_ptr.vmem [resolvable:$true] %s19_s19 }
   0x3   :  { %22 = dma.hbm_to_vmem [thread:$0]  %s18_s17, 64, %s20_s19, [#allocation5]  }
   0x4   :  { %289 = dma.done.wait [#allocation5], 64  }
   0x5   :  { %290 = vsyncadd [#allocation5], 4294967232  ;;  %v34_v0 = vlaneseq  ;;  %v37_v2 = vstv %s388_s0  ;;  %v239_v5 = vld [vmem:[%s390_s2] ss:$0 sm:$0xff]  ;;  %v294_v22 = vmov 683565275  }
   0x6   :  { %v240_v7 = vld [vmem:[%s391_s3] ss:$0 sm:$0xff]  ;;  %v295_v24 = vmov 2475754826   ;;  %v296_v26 = vmov 2131351028  }
   0x7   :  { %v35_v1 = vshrl.u32 %v34_v0, 7  ;;  %v297_v28 = vmov 2102212464   ;;  %v298_v30 = vmov 920167782   ;;  %s301_s0 = smov [#allocation7]  }
   0x8   :  { %v299_v36 = vmov 1326507024   ;;  %s215_s2 = sshll.u32 %s301_s0, 4  ;;  %s217_s26 = sshll.u32 %s392_s4, 4  ;;  %s216_s2 = int_to_ptr.vmem [resolvable:$true] %s215_s2  ;;  %s218_s26 = int_to_ptr.hbm [resolvable:$true] %s217_s26 }
   0x9   :  { %v36_v3 = vmul.u32 2, %v35_v1 }
   0xb   :  { %v38_v4 = vadd.s32 %v37_v2, %v36_v3 }
   0xd   :  { %v39_v6 = vcvt.s32.f32 %v38_v4 }
   0xf   :  { %v44_v8 = vmul.f32 %v239_v5, %v39_v6 }
  0x11   :  { %v49_v9 = vadd.f32 %v240_v7, %v44_v8 }
  0x13   :  { %v339_v10 = vadd.f32 0.7853982, %v49_v9 }
  0x15   :  { %v54_v11 = vand.u32 2139095040, %v339_v10  ;;  %v51_v13 = vand.u32 2147483647, %v339_v10  ;;  %vm53_vm12 = vcmp.lt.s32.totalorder %v339_v10, 0 }
  0x17   :  { %v55_v12 = vshrl.u32 %v54_v11, 23  ;;  %v58_v16 = vand.u32 8388607, %v51_v13  ;;  %v300_v11 = vmov 0   ;;  %vm52_vm13 = vcmp.le.f32.partialorder %v51_v13, 0.7853982 }
  0x19   :  { %v227_v14 = vadd.s32 4294967169, %v55_v12  ;;  %v59_v19 = vor.u32 8388608, %v58_v16 }
  0x1b   :  { %v61_v15 = vadd.s32 1, %v227_v14  ;;  %v348_v38 = vshll.u32 %v59_v19, 8 }
  0x1d   :  { %vm62_vm0 = vcmp.gt.s32.totalorder %v61_v15, 0  ;;  %v100_v50 = vand.u32 65535, %v348_v38  ;;  %v101_v51 = vshrl.u32 %v348_v38, 16 }
  0x1e   :  { %v63_v17 = vsel %vm62_vm0, %v61_v15, 0 }
  0x1f   :  { %v65_v18 = vand.u32 31, %v63_v17  ;;  %v345_v20 = vshrl.u32 %v63_v17, 5 }
  0x21   :  { %v66_v21 = vsub.s32 32, %v65_v18  ;;  %v68_v23 = vshll.u32 %v294_v22, %v65_v18  ;;  %v71_v25 = vshll.u32 %v295_v24, %v65_v18  ;;  %v74_v27 = vshll.u32 %v296_v26, %v65_v18 }
  0x22   :  { %v77_v29 = vshll.u32 %v297_v28, %v65_v18  ;;  %v80_v31 = vshll.u32 %v298_v30, %v65_v18  ;;  %vm83_vm1 = vcmp.lt.s32.totalorder %v345_v20, 1  ;;  %vm86_vm2 = vcmp.lt.s32.totalorder %v345_v20, 4 }
  0x23   :  { %v69_v32 = vshrl.u32 %v295_v24, %v66_v21  ;;  %v72_v33 = vshrl.u32 %v296_v26, %v66_v21  ;;  %v75_v34 = vshrl.u32 %v297_v28, %v66_v21  ;;  %v78_v35 = vshrl.u32 %v298_v30, %v66_v21 }
  0x24   :  { %v81_v37 = vshrl.u32 %v299_v36, %v66_v21  ;;  %vm85_vm3 = vcmp.lt.s32.totalorder %v345_v20, 3  ;;  %vm84_vm4 = vcmp.lt.s32.totalorder %v345_v20, 2  ;;  %v67_v58 = vshrl.u32 %v294_v22, %v66_v21 }
  0x25   :  { %v70_v39 = vor.u32 %v69_v32, %v68_v23  ;;  %v73_v40 = vor.u32 %v72_v33, %v71_v25  ;;  %v76_v41 = vor.u32 %v75_v34, %v74_v27  ;;  %v79_v42 = vor.u32 %v78_v35, %v77_v29 }
  0x26   :  { %v82_v43 = vor.u32 %v81_v37, %v80_v31 }
  0x27   :  { %v91_v44 = vsel %vm83_vm1, %v70_v39, %v73_v40  ;;  %v95_v45 = vsel %vm83_vm1, %v73_v40, %v76_v41  ;;  %v92_v46 = vsel %vm86_vm2, %v79_v42, 920167782  ;;  %v87_v7 = vsel %vm83_vm1, %v67_v58, %v70_v39 }
  0x28   :  { %v96_v47 = vsel %vm86_vm2, %v82_v43, 1326507024  ;;  %v93_v48 = vsel %vm85_vm3, %v76_v41, %v92_v46  ;;  %v88_v9 = vsel %vm86_vm2, %v76_v41, 2102212464  ;;  %vm194_vm1 = vweird.f32 %v339_v10 }
  0x29   :  { %v97_v49 = vsel %vm85_vm3, %v79_v42, %v96_v47  ;;  %v94_v52 = vsel %vm84_vm4, %v91_v44, %v93_v48  ;;  %v89_v22 = vsel %vm85_vm3, %v73_v40, %v88_v9 }
  0x2a   :  { %v98_v53 = vsel %vm84_vm4, %v95_v45, %v97_v49  ;;  %v124_v56 = vand.u32 65535, %v94_v52  ;;  %v125_v57 = vshrl.u32 %v94_v52, 16  ;;  %v90_v30 = vsel %vm84_vm4, %v87_v7, %v89_v22 }
  0x2b   :  { %v102_v54 = vand.u32 65535, %v98_v53  ;;  %v103_v55 = vshrl.u32 %v98_v53, 16  ;;  %v144_v34 = vmul.u32 %v348_v38, %v90_v30 }
  0x2c   :  { %v126_v62 = vmul.u32 %v124_v56, %v100_v50  ;;  %v127_v63 = vmul.u32 %v125_v57, %v100_v50  ;;  %v128_v0 = vmul.u32 %v124_v56, %v101_v51  ;;  %v129_v4 = vmul.u32 %v125_v57, %v101_v51 }
  0x2d   :  { %v104_v59 = vmul.u32 %v102_v54, %v100_v50  ;;  %v105_v60 = vmul.u32 %v103_v55, %v100_v50  ;;  %v106_v61 = vmul.u32 %v102_v54, %v101_v51  ;;  %v107_v1 = vmul.u32 %v103_v55, %v101_v51 }
  0x2e   :  { %v130_v5 = vshll.u32 %v127_v63, 16  ;;  %v132_v6 = vshll.u32 %v128_v0, 16  ;;  %v131_v19 = vshrl.u32 %v127_v63, 16  ;;  %v133_v26 = vshrl.u32 %v128_v0, 16 }
  0x2f   :  { %v108_v2 = vshll.u32 %v105_v60, 16  ;;  %v110_v3 = vshll.u32 %v106_v61, 16  ;;  %v109_v15 = vshrl.u32 %v105_v60, 16  ;;  %v111_v23 = vshrl.u32 %v106_v61, 16 }
  0x30   :  { %vm134_vm6 = vc.u32 %v126_v62, %v130_v5  ;;  %v136_v14 = vadd.s32 %v130_v5, %v126_v62 }
  0x31   :  { %vm112_vm5 = vc.u32 %v104_v59, %v108_v2  ;;  %v114_v8 = vadd.s32 %v108_v2, %v104_v59  ;;  %v135_v17 = vsel %vm134_vm6, 1, %v300_v11 }
  0x32   :  { %v113_v12 = vsel %vm112_vm5, 1, %v300_v11  ;;  %v137_v21 = vadd.s32 %v135_v17, %v129_v4  ;;  %vm138_vm8 = vc.u32 %v136_v14, %v132_v6  ;;  %v140_v29 = vadd.s32 %v136_v14, %v132_v6 }
  0x33   :  { %v115_v16 = vadd.s32 %v113_v12, %v107_v1  ;;  %vm116_vm7 = vc.u32 %v114_v8, %v110_v3  ;;  %v139_v25 = vsel %vm138_vm8, 1, %v300_v11 }
  0x34   :  { %v117_v18 = vsel %vm116_vm7, 1, %v300_v11  ;;  %v141_v27 = vadd.s32 %v139_v25, %v137_v21 }
  0x35   :  { %v119_v24 = vadd.s32 %v117_v18, %v115_v16 }
  0x36   :  { %v142_v31 = vadd.s32 %v141_v27, %v131_v19 }
  0x37   :  { %v120_v28 = vadd.s32 %v119_v24, %v109_v15  ;;  %v207_v24 = vld [vmem:[#allocation4] sm:$0xf] }
  0x38   :  { %v143_v33 = vadd.s32 %v142_v31, %v133_v26 }
  0x39   :  { %v121_v32 = vadd.s32 %v120_v28, %v111_v23 }
  0x3a   :  { %v147_v35 = vadd.s32 1, %v143_v33 }
  0x3b   :  { %vm146_vm9 = vc.u32 %v121_v32, %v140_v29  ;;  %v145_v20 = vadd.s32 %v140_v29, %v121_v32 }
  0x3c   :  { %v148_v36 = vsel %vm146_vm9, %v147_v35, %v143_v33 }
  0x3d   :  { %v149_v37 = vadd.s32 %v148_v36, %v144_v34 }
  0x3f   :  { %v150_v39 = vadd.s32 536870912, %v149_v37 }
  0x41   :  { %v151_v40 = vshrl.u32 %v150_v39, 30 }
  0x43   :  { %v152_v41 = vshll.u32 %v151_v40, 30  ;;  %v175_v58 = vsub.s32 4, %v151_v40 }
  0x45   :  { %v153_v42 = vsub.s32 %v149_v37, %v152_v41  ;;  %v176_v61 = vsel %vm53_vm12, %v175_v58, %v151_v40 }
  0x46   :  { %v178_v0 = vsel %vm52_vm13, 0, %v176_v61 }
  0x47   :  { %vm154_vm10 = vcmp.lt.s32.totalorder %v153_v42, 0  ;;  %v155_v43 = vsub.s32 0, %v153_v42  ;;  %v195_v5 = vadd.s32 3, %v178_v0 }
  0x49   :  { %v156_v44 = vsel %vm154_vm10, %v155_v43, %v153_v42  ;;  %v196_v11 = vand.u32 3, %v195_v5 }
  0x4a   :  { %v157_v45 = vclz %v156_v44 }
  0x4b   :  { %vm201_vm14 = vcmp.eq.s32.totalorder %v196_v11, 2  ;;  %vm198_vm15 = vcmp.eq.s32.totalorder %v196_v11, 0  ;;  %vm197_vm0 = vcmp.lt.s32.totalorder %v196_v11, 2 }
  0x4c   :  { %v228_v46 = vadd.s32 4294967294, %v157_v45 }
  0x4e   :  { %vm229_vm11 = vcmp.lt.s32.totalorder %v228_v46, 0 }
  0x4f   :  { %v160_v47 = vsel %vm229_vm11, 0, %v228_v46 }
  0x50   :  { %v161_v48 = vsub.s32 32, %v160_v47  ;;  %v162_v49 = vshll.u32 %v153_v42, %v160_v47  ;;  %v165_v50 = vsub.s32 4294967266, %v160_v47 }
  0x52   :  { %v163_v38 = vshrl.u32 %v145_v20, %v161_v48  ;;  %v166_v51 = vadd.s32 127, %v165_v50 }
  0x54   :  { %v164_v52 = vor.u32 %v163_v38, %v162_v49  ;;  %v167_v53 = vshll.u32 %v166_v51, 23 }
  0x56   :  { %v168_v54 = vor.u32 4788187, %v167_v53  ;;  %v171_v55 = vcvt.s32.f32 %v164_v52 }
  0x58   :  { %v169_v56 = vand.u32 2147483647, %v168_v54 }
  0x5a   :  { %v172_v57 = vmul.f32 %v171_v55, %v169_v56 }
  0x5c   :  { %v173_v59 = vxor.u32 2147483648, %v172_v57 }
  0x5e   :  { %v174_v60 = vsel %vm53_vm12, %v173_v59, %v172_v57 }
  0x5f   :  { %v177_v62 = vsel %vm52_vm13, %v339_v10, %v174_v60 }
  0x60   :  { %v179_v63 = vmul.f32 %v177_v62, %v177_v62 }
  0x62   :  { %v180_v1 = vmul.f32 -0.001358992, %v179_v63  ;;  %v187_v2 = vmul.f32 -0.00019511016, %v179_v63 }
  0x64   :  { %v181_v3 = vadd.f32 0.041655596, %v180_v1  ;;  %v188_v4 = vadd.f32 0.008332121, %v187_v2 }
  0x66   :  { %v182_v6 = vmul.f32 %v181_v3, %v179_v63  ;;  %v189_v7 = vmul.f32 %v188_v4, %v179_v63 }
  0x68   :  { %v183_v8 = vadd.f32 -0.4999988, %v182_v6  ;;  %v190_v9 = vadd.f32 -0.16666654, %v189_v7 }
  0x6a   :  { %v184_v12 = vmul.f32 %v183_v8, %v179_v63  ;;  %v191_v14 = vmul.f32 %v190_v9, %v179_v63 }
  0x6c   :  { %v185_v13 = vadd.f32 1.0, %v184_v12  ;;  %v192_v15 = vadd.f32 1.0, %v191_v14 }
  0x6e   :  { %v193_v16 = vmul.f32 %v192_v15, %v177_v62  ;;  %v202_v17 = vxor.u32 2147483648, %v185_v13 }
  0x70   :  { %v199_v18 = vxor.u32 2147483648, %v193_v16  ;;  %v203_v19 = vsel %vm201_vm14, %v202_v17, %v193_v16 }
  0x72   :  { %v200_v21 = vsel %vm198_vm15, %v185_v13, %v199_v18 }
  0x73   :  { %v204_v22 = vsel %vm197_vm0, %v200_v21, %v203_v19 }
  0x74   :  { %v205_v23 = vsel %vm194_vm1, nan, %v204_v22 }
  0x75   :  { %v206_v25 = vmul.f32 1.4142135, %v205_v23 }
  0x77   :  { %v208_v26 = vadd.f32 %v207_v24, %v206_v25 }
  0x79   :  { %209 = vst [vmem:[#allocation7] sm:$0xf] %v208_v26 }
  0x7a   :  { %220 = dma.vmem_to_hbm [thread:$0]  %s216_s2, 64, %s218_s26, [#allocation6]  }
  0x7b   :  { %291 = dma.done.wait [#allocation6], 64  }
  0x7c   :  { %292 = vsyncadd [#allocation6], 4294967232 }
  0x7d   :  { %225 = vsyncpa [#allocation5], 1 }
  0x7e   :  { %226 = vsyncpa [#allocation6], 1 }

</bundles_post_ra>
